<compile_context>
chip_gen: v6e
topology: v6e:2x2x1
jax: 0.10.0
libtpu: 0.0.40
codegen_flags: <defaults>
</compile_context>

<pallas_src>
import math

import jax
import jax.numpy as jnp
from jax import lax
from jax.experimental import pallas as pl
from jax.experimental.pallas import tpu as pltpu


def _round_up(n, m):
    return ((n + m - 1) // m) * m


# --------------------------------------------------------------------------
# Kernel: one batch tile per grid step.
#   x_ref  : [tb, D_in]   input tile (pipelined over the batch grid)
#   w_ref  : [D_in, H]    fused affine weight  (VMEM-resident across steps)
#   wb_ref : [3, H]       row 0 = b_fused, row 1 = fc_2 weight (as a row),
#                         row 2 = fc_2 bias broadcast
#   out_ref: [1, 1, tb]   lane-dense output tile (batch on the lane axis)
# --------------------------------------------------------------------------
def fused_attention_kernel(x_ref, w_ref, wb_ref, out_ref):
    f32 = jnp.float32
    x = x_ref[...]                    # [tb, D_in]
    w = w_ref[...]                    # [D_in, H]
    wb = wb_ref[...]                  # [3, H]
    b_fused = wb[0:1, :]              # [1, H]
    w2_row = wb[1:2, :]               # [1, H]  (fc_2 weight, transposed)
    b2 = wb[2:3, 0:1]                 # [1, 1]  (fc_2 bias)

    # embedding -> (trivial seq-1 attention) -> out_proj -> fc_1, all folded
    # into a single affine map, followed by ReLU.
    h = jnp.maximum(
        jnp.dot(x, w, preferred_element_type=f32) + b_fused, 0.0)   # [tb, H]

    # fc_2: contract over H without transposing h; result [1, tb] is
    # lane-dense (batch on the lane axis) for an unmasked store.
    y = lax.dot_general(w2_row, h, (((1,), (1,)), ((), ())),
                        preferred_element_type=f32)                  # [1, tb]
    out_ref[...] = (y + b2)[None]                                    # [1, 1, tb]


# --------------------------------------------------------------------------
# Host-side, one-time parameter folding (seq_len == 1  =>  softmax weight == 1)
# --------------------------------------------------------------------------
def fuse_params(p):
    w_fused = p["we"] @ p["wv"] @ p["wo"] @ p["w1"]                          # [D_in, H]
    b_fused = ((p["be"] @ p["wv"] + p["bv"]) @ p["wo"] + p["bo"]) @ p["w1"] + p["b1"]  # [1, H]
    w2_row = p["w2"].T                                                       # [1, H]
    b2_row = jnp.broadcast_to(p["b2"], (1, w2_row.shape[1]))                 # [1, H]
    wb_pack = jnp.concatenate([b_fused, w2_row, b2_row], axis=0)             # [3, H]
    return {"w_fused": w_fused.astype(jnp.float32),
            "wb_pack": wb_pack.astype(jnp.float32)}


def attention_forward(x, fused, *, block_b=512):
    """x: [B, input_size] float32 -> [B] float32."""
    B, d_in = x.shape
    w_fused = fused["w_fused"]        # [d_in, H]
    wb_pack = fused["wb_pack"]        # [3, H]
    H = w_fused.shape[1]

    # Batch tile: multiple of 8 (f32 sublanes), capped at block_b.
    tb = min(block_b, _round_up(B, 8))
    nb = pl.cdiv(B, tb)
    Bp = nb * tb
    if Bp != B:
        x = jnp.pad(x, ((0, Bp - B), (0, 0)))

    y = pl.pallas_call(
        fused_attention_kernel,
        out_shape=jax.ShapeDtypeStruct((nb, 1, tb), jnp.float32),
        grid=(nb,),
        in_specs=[
            pl.BlockSpec((tb, d_in), lambda i: (i, 0)),   # x: pipelined tiles
            pl.BlockSpec((d_in, H), lambda i: (0, 0)),    # fused weight: resident
            pl.BlockSpec((3, H), lambda i: (0, 0)),       # packed biases + fc_2
        ],
        out_specs=pl.BlockSpec((1, 1, tb), lambda i: (i, 0, 0)),
        compiler_params=pltpu.CompilerParams(
            dimension_semantics=("parallel",)),
    )(x, w_fused, wb_pack)

    return y.reshape(Bp)[:B]


# --------------------------------------------------------------------------
# Synthetic params (PyTorch-style uniform(-1/sqrt(fan_in), +)) + JAX reference
# --------------------------------------------------------------------------
def init_params(key, input_size, hidden):
    ks = jax.random.split(key, 16)

    def lin(kw, kb, fan_in, fan_out):
        bound = 1.0 / math.sqrt(fan_in)
        w = jax.random.uniform(kw, (fan_in, fan_out), jnp.float32, -bound, bound)
        b = jax.random.uniform(kb, (1, fan_out), jnp.float32, -bound, bound)
        return w, b

    p = {}
    p["we"], p["be"] = lin(ks[0], ks[1], input_size, hidden)    # embedding
    p["wq"], p["bq"] = lin(ks[2], ks[3], hidden, hidden)        # MHA in_proj (q)  (dead: softmax==1)
    p["wk"], p["bk"] = lin(ks[4], ks[5], hidden, hidden)        # MHA in_proj (k)  (dead: softmax==1)
    p["wv"], p["bv"] = lin(ks[6], ks[7], hidden, hidden)        # MHA in_proj (v)
    p["wo"], p["bo"] = lin(ks[8], ks[9], hidden, hidden)        # MHA out_proj
    p["w1"], p["b1"] = lin(ks[10], ks[11], hidden, hidden)      # fc_1
    p["w2"], p["b2"] = lin(ks[12], ks[13], hidden, 1)           # fc_2
    return p


def reference_forward(x, p):
    """Pure-JAX reference mirroring the PyTorch module faithfully."""
    e = x @ p["we"] + p["be"]
    q = e @ p["wq"] + p["bq"]
    k = e @ p["wk"] + p["bk"]
    v = e @ p["wv"] + p["bv"]
    s = jnp.sum(q * k, axis=-1, keepdims=True) / math.sqrt(e.shape[-1])
    w = jax.nn.softmax(s[..., None], axis=-1)[..., 0]   # softmax over seq len 1 -> exactly 1
    attn = w * v
    o = attn @ p["wo"] + p["bo"]
    h = jax.nn.relu(o @ p["w1"] + p["b1"])
    y = h @ p["w2"] + p["b2"]
    return y[:, 0]


if __name__ == "__main__":
    batch = 8
    input_size = 16
    hidden_channels = 32

    key = jax.random.PRNGKey(0)
    kx, kp = jax.random.split(key)
    x = jax.random.normal(kx, (batch, input_size), dtype=jnp.float32)
    params = init_params(kp, input_size, hidden_channels)
    fused = fuse_params(params)

    out = attention_forward(x, fused)
    out = jax.block_until_ready(out)

    ref = reference_forward(x, params)
    assert out.shape == (batch,), out.shape
    assert jnp.allclose(out, ref, rtol=1e-4, atol=1e-4), (out, ref)

    print("KERNEL_OK")
</pallas_src>

<mosaic_0001>
module attributes {stable_mosaic.version = 11 : i64} {
  func.func @fused_attention_kernel(%arg0: i32, %arg1: memref<8x16xf32, #tpu.memory_space<vmem>>, %arg2: memref<16x32xf32, #tpu.memory_space<vmem>>, %arg3: memref<3x32xf32, #tpu.memory_space<vmem>>, %arg4: memref<1x1x8xf32, #tpu.memory_space<vmem>>) attributes {dimension_semantics = [#tpu.dimension_semantics<parallel>], iteration_bounds = array<i64: 1>, scalar_prefetch = 0 : i64, scratch_operands = 0 : i64, tpu.core_type = #tpu.core_type<tc>, window_params = [{transform_indices = @transform_0, window_bounds = array<i64: 8, 16>}, {pipeline_mode = #tpu.pipeline_mode<synchronous>, transform_indices = @transform_1, window_bounds = array<i64: 16, 32>}, {pipeline_mode = #tpu.pipeline_mode<synchronous>, transform_indices = @transform_2, window_bounds = array<i64: 3, 32>}, {transform_indices = @transform_3, window_bounds = array<i64: 1, 1, 8>}]} {
    %c0 = arith.constant 0 : index
    %c0_0 = arith.constant 0 : index
    %0 = vector.load %arg1[%c0, %c0_0] : memref<8x16xf32, #tpu.memory_space<vmem>>, vector<8x16xf32>
    %c0_1 = arith.constant 0 : index
    %c0_2 = arith.constant 0 : index
    %1 = vector.load %arg2[%c0_1, %c0_2] : memref<16x32xf32, #tpu.memory_space<vmem>>, vector<16x32xf32>
    %c0_3 = arith.constant 0 : index
    %c0_4 = arith.constant 0 : index
    %2 = vector.load %arg3[%c0_3, %c0_4] : memref<3x32xf32, #tpu.memory_space<vmem>>, vector<3x32xf32>
    %3 = vector.extract_strided_slice %2 {offsets = [0, 0], sizes = [1, 32], strides = [1, 1]} : vector<3x32xf32> to vector<1x32xf32>
    %4 = vector.extract_strided_slice %2 {offsets = [1, 0], sizes = [1, 32], strides = [1, 1]} : vector<3x32xf32> to vector<1x32xf32>
    %5 = vector.extract_strided_slice %2 {offsets = [2, 0], sizes = [1, 1], strides = [1, 1]} : vector<3x32xf32> to vector<1x1xf32>
    %cst = arith.constant dense<0.000000e+00> : vector<8x32xf32>
    %6 = tpu.matmul %0, %1, %cst {dimension_numbers = #tpu.dot_dimension_numbers<[1], [0], [0], [1], [0, 0, 1, 1], [], []>} : vector<8x16xf32>, vector<16x32xf32>, vector<8x32xf32> -> vector<8x32xf32>
    %7 = vector.broadcast %3 : vector<1x32xf32> to vector<8x32xf32>
    %8 = arith.addf %6, %7 : vector<8x32xf32>
    %cst_5 = arith.constant 0.000000e+00 : f32
    %9 = vector.broadcast %cst_5 : f32 to vector<8x32xf32>
    %10 = arith.maximumf %8, %9 : vector<8x32xf32>
    %cst_6 = arith.constant dense<0.000000e+00> : vector<1x8xf32>
    %11 = tpu.matmul %4, %10, %cst_6 {dimension_numbers = #tpu.dot_dimension_numbers<[1], [1], [0], [0], [0, 0, 1, 0], [], []>} : vector<1x32xf32>, vector<8x32xf32>, vector<1x8xf32> -> vector<1x8xf32>
    %12 = vector.broadcast %5 : vector<1x1xf32> to vector<1x8xf32>
    %13 = arith.addf %11, %12 : vector<1x8xf32>
    %14 = vector.shape_cast %13 : vector<1x8xf32> to vector<1x1x8xf32>
    %c0_7 = arith.constant 0 : index
    %c0_8 = arith.constant 0 : index
    %c0_9 = arith.constant 0 : index
    %15 = vector.load %arg4[%c0_7, %c0_8, %c0_9] : memref<1x1x8xf32, #tpu.memory_space<vmem>>, vector<1x1x8xf32>
    tpu.vector_store %arg4[%c0_7, %c0_8, %c0_9], %14 {strides = array<i32>} : memref<1x1x8xf32, #tpu.memory_space<vmem>>, vector<1x1x8xf32>,
    return
  }
  func.func @transform_0(%arg0: i32) -> (i32, i32) {
    %c0_i32 = arith.constant 0 : i32
    %c0_i32_0 = arith.constant 0 : i32
    return %arg0, %c0_i32 : i32, i32
  }
  func.func @transform_1(%arg0: i32) -> (i32, i32) {
    %c0_i32 = arith.constant 0 : i32
    %c0_i32_0 = arith.constant 0 : i32
    %c0_i32_1 = arith.constant 0 : i32
    return %c0_i32, %c0_i32_0 : i32, i32
  }
  func.func @transform_2(%arg0: i32) -> (i32, i32) {
    %c0_i32 = arith.constant 0 : i32
    %c0_i32_0 = arith.constant 0 : i32
    %c0_i32_1 = arith.constant 0 : i32
    return %c0_i32, %c0_i32_0 : i32, i32
  }
  func.func @transform_3(%arg0: i32) -> (i32, i32, i32) {
    %c0_i32 = arith.constant 0 : i32
    %c0_i32_0 = arith.constant 0 : i32
    %c0_i32_1 = arith.constant 0 : i32
    return %arg0, %c0_i32, %c0_i32_0 : i32, i32, i32
  }
}

</mosaic_0001>

<bundles_post_ra>
// kernel: tpu_custom_call.1
= control target key start
LH: loop header
LB: loop body
LE: loop exit
PB: predicated region body
PF: predicated region fallthrough
CT: control target
= control target key end

     0   :  { %8 = vsyncpa [#allocation3], 0  ;;  %s393_s0 = inlined_call_operand.hbm [shape: f32[8,16], index: 0, kind: input, shape index: {}]   ;;  %s394_s1 = inlined_call_operand.hbm [shape: f32[16,32], index: 1, kind: input, shape index: {}]   ;;  %s395_s2 = inlined_call_operand.hbm [shape: f32[3,32], index: 2, kind: input, shape index: {}]   ;;  %s396_s3 = inlined_call_operand.hbm [shape: f32[1,1,8], index: 3, kind: output, shape index: {}]  }
   0x1   :  { %9 = vsyncpa [#allocation6], 0 }
   0x2   :  { %10 = vsyncpa [#allocation4], 0  ;;  %s352_s12 = smov [#allocation5]  }
   0x3   :  { %s26_s13 = sshll.u32 %s352_s12, 4  ;;  %s27_s13 = int_to_ptr.vmem [resolvable:$true] %s26_s13 }
   0x4   :  { %s274_s14 = scalar_lea.vmem %s27_s13, 256  ;;  %p279_p1 = scmp.lt.s32.totalorder %s27_s13, %s27_s13 }
   0x5   :  { %p275_p0 = scmp.ne.s32.totalorder %s27_s13, %s274_s14  ;;  %p280_p2 = scmp.lt.s32.totalorder %s274_s14, %s274_s14 }
   0x7   :  { %p281_p3 = por %p280_p2, %p279_p1 }
   0x9   :  { %p282_p4 = pnand %p281_p3, %p275_p0 }
   0xb   :  { %285 = shalt.err (!%p282_p4)
}
   0xc   :  { %s353_s15 = smov 128   ;;  %s354_s16 = smov 8  }
   0xd   :  { %32 = dma.hbm_to_vmem [thread:$0]  %s394_s1, 256, %s27_s13, [#allocation6], %s353_s15, %s353_s15, %s354_s16  }
   0xe   :  { %s355_s19 = smov [#allocation2]   ;;  %s356_s21 = smov [#allocation7]  }
   0xf   :  { %s17_s20 = sshll.u32 %s355_s19, 4  ;;  %s39_s22 = sshll.u32 %s356_s21, 4  ;;  %s18_s20 = int_to_ptr.vmem [resolvable:$true] %s17_s20  ;;  %s40_s22 = int_to_ptr.vmem [resolvable:$true] %s39_s22 }
  0x10   :  { %s294_s23 = scalar_lea.vmem %s18_s20, 128  ;;  %p299_p6 = scmp.lt.s32.totalorder %s18_s20, %s18_s20 }
  0x11   :  { %p295_p5 = scmp.ne.s32.totalorder %s18_s20, %s294_s23  ;;  %p300_p7 = scmp.lt.s32.totalorder %s294_s23, %s294_s23 }
  0x13   :  { %p301_p8 = por %p300_p7, %p299_p6 }
  0x15   :  { %p302_p9 = pnand %p301_p8, %p295_p5 }
  0x17   :  { %305 = shalt.err (!%p302_p9)
}
  0x18   :  { %20 = dma.hbm_to_vmem [thread:$0]  %s393_s0, 128, %s18_s20, [#allocation3]  }
  0x19   :  { %s314_s26 = scalar_lea.vmem %s40_s22, 64  ;;  %p319_p11 = scmp.lt.s32.totalorder %s40_s22, %s40_s22 }
  0x1a   :  { %p315_p10 = scmp.ne.s32.totalorder %s40_s22, %s314_s26  ;;  %p320_p12 = scmp.lt.s32.totalorder %s314_s26, %s314_s26 }
  0x1c   :  { %p321_p13 = por %p320_p12, %p319_p11 }
  0x1e   :  { %p322_p0 = pnand %p321_p13, %p315_p10 }
  0x20   :  { %325 = shalt.err (!%p322_p0)
}
  0x21   :  { %42 = dma.hbm_to_vmem [thread:$0]  %s395_s2, 64, %s40_s22, [#allocation6]  }
  0x22   :  { %346 = dma.done.wait [#allocation3], 128  }
  0x23   :  { %347 = vsyncadd [#allocation3], 4294967168 }
  0x24   :  { %348 = dma.done.wait [#allocation6], 320  }
  0x25   :  { %349 = vsyncadd [#allocation6], 4294966976  ;;  %v357_v0 = vmov 0.0   ;;  %vm358_vm0 = vmmov 0   ;;  %v54_v1 = vld [vmem:[#allocation5 + $0x8] sm:$0xff]  ;;  %v53_v2 = vld [vmem:[#allocation5] sm:$0xff]  ;;  %v56_v6 = vlaneseq }
  0x26   :  { %244 = vmatprep.subr.mxu0 %v357_v0  ;;  %248 = vmatprep.mubr.msk.f32.mxu0 %vm358_vm0, %v357_v0  ;;  %v52_v3 = vld [vmem:[#allocation2] sm:$0xff]  ;;  %vm60_vm1 = vcmask 130048   ;;  %v55_v4 = vld [vmem:[#allocation7] sm:$0x7]  ;;  %v359_v5 = vmov 0   ;;  %vm142_vm2 = vcmask 261120  }
  0x27   :  { %251 = vmatprep.subr.mxu1 %v357_v0  ;;  %253 = vmatprep.mubr.msk.f32.mxu1 %vm358_vm0, %v357_v0  ;;  %v57_v7 = vshrl.u32 %v56_v6, 7  ;;  %v139_v14 = vrot.slane %v55_v4, 1  ;;  %s360_s0 = smov [#allocation8]   ;;  %vm218_vm3 = vcmask 57344  }
  0x28   :  { %245 = vmatpush3.msra.mxu0 %v54_v1  ;;  %265 = vset.pattern.permute.xlu0 %v359_v5  ;;  %s226_s2 = sshll.u32 %s360_s0, 4  ;;  %s227_s2 = int_to_ptr.vmem [resolvable:$true] %s226_s2 }
  0x29   :  { %246 = vmatprep.subr.mxu0 %v357_v0  ;;  %137 = vperm.xlu0 %265, %v55_v4   ;;  %v58_v8 = vsub.s32 0, %v57_v7  ;;  %s326_s28 = scalar_lea.vmem %s227_s2, 16  ;;  %s330_s29 = scalar_lea.vmem %s227_s2, 32 }
  0x2a   :  { %247 = vmatpush3.msra.mxu0 %v53_v2  ;;  %p327_p1 = scmp.ne.s32.totalorder %s227_s2, %s326_s28  ;;  %p331_p2 = scmp.lt.s32.totalorder %s227_s2, %s227_s2 }
  0x2b   :  { %249 = vmatmul.mubr.msk.f32.vlgmr.msra.gmra.mxu0 %vm60_vm1, %v52_v3  ;;  %v59_v9 = vrot.slane %v55_v4, %v58_v8  ;;  %p332_p3 = scmp.lt.s32.totalorder %s330_s29, %s326_s28 }
  0x2d   :  { %p333_p4 = por %p332_p3, %p331_p2 }
  0x2f   :  { %p334_p5 = pnand %p333_p4, %p327_p1 }
  0xa4   :  { %v138_v15 = vpop.permute.xlu0 %137 }
  0xa5   :  { %v140_v16 = vrot.slane %v138_v15, 2 }
  0xeb   :  { %v130_v10 = vpop.f32.mrf.mxu0 }
  0xec   :  { %v131_v11 = vadd.f32 %v130_v10, %v59_v9 }
  0xed   :  { %v250_v12 = vpop.f32.mrf.mxu0 }
  0xee   :  { %v134_v13 = vmax.f32 %v131_v11, 0.0 }
  0xf0   :  { %252 = vmatpush3.xpose.msk.msra.mxu1 %vm142_vm2, %v134_v13 }
  0xf3   :  { %254 = vmatmul.mubr.msk.f32.vlgmr.msra.gmra.mxu1 %vm142_vm2, %v139_v14 }
 0x1b3   :  { %v214_v17 = vpop.f32.mrf.mxu1 }
 0x1b4   :  { %v215_v18 = vadd.f32 %v214_v17, %v140_v16 }
 0x1b5   :  { %v255_v19 = vpop.f32.mrf.mxu1 }
 0x1b6   :  { %219 = vst.msk [vmem:[#allocation8] sm:$0x1] %vm218_vm3, %v215_v18 }
 0x1b7   :  { %337 = shalt.err (!%p334_p5)
}
 0x1b8   :  { %229 = dma.vmem_to_hbm [thread:$0]  %s227_s2, 16, %s396_s3, [#allocation4]  }
 0x1b9   :  { %350 = dma.done.wait [#allocation4], 16  }
 0x1ba   :  { %351 = vsyncadd [#allocation4], 4294967280 }
 0x1bb   :  { %233 = vsyncpa [#allocation3], 1 }
 0x1bc   :  { %234 = vsyncpa [#allocation6], 1 }
 0x1bd   :  { %235 = vsyncpa [#allocation4], 1 }

</bundles_post_ra>
